<compile_context>
chip_gen: v7x
topology: tpu7x:2x2x1
jax: 0.10.0
libtpu: 0.0.40
codegen_flags: <defaults>
</compile_context>

<pallas_src>
import jax
import jax.numpy as jnp
from jax import lax
from jax.experimental import pallas as pl
from jax.experimental.pallas import tpu as pltpu


def _cdiv(a: int, b: int) -> int:
    return (a + b - 1) // b


def valuelr_kernel(rows_ref, cols_ref, l_ref, r_ref, out_ref):
    # rows_ref / cols_ref: (1, 1, tb) int32 batch tiles of the index pairs.
    # l_ref: (n, K) VMEM-resident L.   r_ref: (K, m) VMEM-resident R.
    # out_ref: (1, 1, tb) f32, lane-dense.
    tb = rows_ref.shape[-1]
    n, K = l_ref.shape
    m = r_ref.shape[-1]

    rows = rows_ref[0]                                   # (1, tb) int32
    cols = cols_ref[0]                                   # (1, tb) int32

    # Transposed one-hot selectors (VPU compare); OOB index -> all-zero column.
    oh_r = (lax.broadcasted_iota(jnp.int32, (n, tb), 0) == rows).astype(jnp.float32)  # (n, tb)
    oh_c = (lax.broadcasted_iota(jnp.int32, (m, tb), 0) == cols).astype(jnp.float32)  # (m, tb)

    l32 = l_ref[...].astype(jnp.float32)                 # upcast in-register if bf16
    r32 = r_ref[...].astype(jnp.float32)

    hi = lax.Precision.HIGHEST                           # keep gather/reduce at f32 accuracy
    # MXU gathers:  lg_t[j, i] = L[rows[i], j]   rg_t[j, i] = R[j, cols[i]]
    lg_t = lax.dot_general(l32, oh_r, (((0,), (0,)), ((), ())),
                           precision=hi, preferred_element_type=jnp.float32)   # (K, tb)
    rg_t = lax.dot_general(r32, oh_c, (((1,), (0,)), ((), ())),
                           precision=hi, preferred_element_type=jnp.float32)   # (K, tb)

    prod = lg_t * rg_t                                   # (K, tb)  VPU elementwise

    # Lane-dense reduction over K via a ones-vector MXU contraction -> (1, tb).
    ones = jnp.ones((1, K), jnp.float32)
    s = lax.dot_general(ones, prod, (((1,), (0,)), ((), ())),
                        precision=hi, preferred_element_type=jnp.float32)      # (1, tb)
    out_ref[...] = s[None, :, :]                         # (1, 1, tb) unmasked full-lane store


def value_lr_forward(L, R, rows, cols, *, tb_max=2048):
    """(L @ R)[rows[i], cols[i]] for each i, returned as (B,) float32."""
    rows = jnp.asarray(rows, dtype=jnp.int32)
    cols = jnp.asarray(cols, dtype=jnp.int32)
    B = rows.shape[0]
    n, K = L.shape
    Kr, m = R.shape
    assert Kr == K, "L and R contraction dims must match"

    # Adaptive batch tiling: tb multiple of 128, <= tb_max, minimal tail padding.
    lanes = _cdiv(max(B, 1), 128)                        # 128-lane chunks needed
    num_tiles = _cdiv(lanes, max(tb_max // 128, 1))
    tb = 128 * _cdiv(lanes, num_tiles)
    Bp = tb * num_tiles

    if Bp != B:
        # Pad with index 0 (always valid); the tail is sliced off below.
        rows = jnp.pad(rows, (0, Bp - B))
        cols = jnp.pad(cols, (0, Bp - B))
    rows = rows.reshape(num_tiles, 1, tb)
    cols = cols.reshape(num_tiles, 1, tb)

    # Note: for B >> n*m an L @ R precompute + (rows, cols) lookup fast path
    # would beat per-pair K-length dot products; unnecessary at these sizes.
    out = pl.pallas_call(
        valuelr_kernel,
        out_shape=jax.ShapeDtypeStruct((num_tiles, 1, tb), jnp.float32),
        grid_spec=pltpu.PrefetchScalarGridSpec(
            num_scalar_prefetch=0,
            grid=(num_tiles,),
            in_specs=[
                pl.BlockSpec((1, 1, tb), lambda i: (i, 0, 0)),   # rows tile
                pl.BlockSpec((1, 1, tb), lambda i: (i, 0, 0)),   # cols tile
                pl.BlockSpec((n, K), lambda i: (0, 0)),          # L, VMEM-resident
                pl.BlockSpec((K, m), lambda i: (0, 0)),          # R, VMEM-resident
            ],
            out_specs=pl.BlockSpec((1, 1, tb), lambda i: (i, 0, 0)),
        ),
        compiler_params=pltpu.CompilerParams(
            # pltpu.CORE_PARALLEL here would split batch tiles across v7x's two
            # TensorCores; plain "parallel" kept for cross-generation safety.
            dimension_semantics=("parallel",),
        ),
    )(rows, cols, L, R)

    return out.reshape(-1)[:B]


if __name__ == "__main__":
    # Small deterministic example (mirrors torch.randn * scale init in __init__).
    n, m, k = 32, 24, 128
    scale = 1.0
    B = 16  # number of (row, col) index pairs

    key = jax.random.PRNGKey(0)
    kL, kR, kr, kc = jax.random.split(key, 4)
    L = scale * jax.random.normal(kL, (n, k), dtype=jnp.float32)
    R = scale * jax.random.normal(kR, (k, m), dtype=jnp.float32)
    rows = jax.random.randint(kr, (B,), 0, n, dtype=jnp.int32)
    cols = jax.random.randint(kc, (B,), 0, m, dtype=jnp.int32)

    fwd = jax.jit(value_lr_forward, static_argnames=("tb_max",))
    out = jax.block_until_ready(fwd(L, R, rows, cols))

    # Pure-JAX reference of the exact PyTorch semantics.
    ref = jnp.sum(L[rows, :] * jnp.transpose(R)[cols, :], axis=-1)
    assert out.shape == (B,) and out.dtype == jnp.float32
    assert jnp.allclose(out, ref, rtol=1e-5, atol=1e-3), "mismatch vs reference"

    print("KERNEL_OK")
</pallas_src>

<mosaic_0001>
module attributes {stable_mosaic.version = 11 : i64} {
  func.func @valuelr_kernel(%arg0: i32, %arg1: memref<1x1x128xi32, #tpu.memory_space<vmem>>, %arg2: memref<1x1x128xi32, #tpu.memory_space<vmem>>, %arg3: memref<32x128xf32, #tpu.memory_space<vmem>>, %arg4: memref<128x24xf32, #tpu.memory_space<vmem>>, %arg5: memref<1x1x128xf32, #tpu.memory_space<vmem>>) attributes {dimension_semantics = [#tpu.dimension_semantics<parallel>], iteration_bounds = array<i64: 1>, scalar_prefetch = 0 : i64, scratch_operands = 0 : i64, tpu.core_type = #tpu.core_type<tc>, window_params = [{transform_indices = @transform_0, window_bounds = array<i64: 1, 1, 128>}, {transform_indices = @transform_1, window_bounds = array<i64: 1, 1, 128>}, {pipeline_mode = #tpu.pipeline_mode<synchronous>, transform_indices = @transform_2, window_bounds = array<i64: 32, 128>}, {pipeline_mode = #tpu.pipeline_mode<synchronous>, transform_indices = @transform_3, window_bounds = array<i64: 128, 24>}, {transform_indices = @transform_4, window_bounds = array<i64: 1, 1, 128>}]} {
    %c0 = arith.constant 0 : index
    %c0_0 = arith.constant 0 : index
    %c0_1 = arith.constant 0 : index
    %0 = vector.load %arg1[%c0, %c0_0, %c0_1] : memref<1x1x128xi32, #tpu.memory_space<vmem>>, vector<1x1x128xi32>
    %1 = vector.shape_cast %0 : vector<1x1x128xi32> to vector<1x128xi32>
    %c0_2 = arith.constant 0 : index
    %c0_3 = arith.constant 0 : index
    %c0_4 = arith.constant 0 : index
    %2 = vector.load %arg2[%c0_2, %c0_3, %c0_4] : memref<1x1x128xi32, #tpu.memory_space<vmem>>, vector<1x1x128xi32>
    %3 = vector.shape_cast %2 : vector<1x1x128xi32> to vector<1x128xi32>
    %4 = tpu.iota {dimensions = array<i32: 0>} : vector<32x128xi32>
    %5 = vector.broadcast %1 : vector<1x128xi32> to vector<32x128xi32>
    %6 = arith.cmpi eq, %4, %5 : vector<32x128xi32>
    %7 = arith.extui %6 : vector<32x128xi1> to vector<32x128xi32>
    %8 = arith.sitofp %7 : vector<32x128xi32> to vector<32x128xf32>
    %9 = tpu.iota {dimensions = array<i32: 0>} : vector<24x128xi32>
    %10 = vector.broadcast %3 : vector<1x128xi32> to vector<24x128xi32>
    %11 = arith.cmpi eq, %9, %10 : vector<24x128xi32>
    %12 = arith.extui %11 : vector<24x128xi1> to vector<24x128xi32>
    %13 = arith.sitofp %12 : vector<24x128xi32> to vector<24x128xf32>
    %c0_5 = arith.constant 0 : index
    %c0_6 = arith.constant 0 : index
    %14 = vector.load %arg3[%c0_5, %c0_6] : memref<32x128xf32, #tpu.memory_space<vmem>>, vector<32x128xf32>
    %c0_7 = arith.constant 0 : index
    %c0_8 = arith.constant 0 : index
    %15 = vector.load %arg4[%c0_7, %c0_8] : memref<128x24xf32, #tpu.memory_space<vmem>>, vector<128x24xf32>
    %cst = arith.constant dense<0.000000e+00> : vector<128x128xf32>
    %16 = tpu.matmul %14, %8, %cst {dimension_numbers = #tpu.dot_dimension_numbers<[0], [0], [1], [1], [0, 1, 1, 1], [], []>, precision = #tpu.contract_precision<fp32>} : vector<32x128xf32>, vector<32x128xf32>, vector<128x128xf32> -> vector<128x128xf32>
    %cst_9 = arith.constant dense<0.000000e+00> : vector<128x128xf32>
    %17 = tpu.matmul %15, %13, %cst_9 {dimension_numbers = #tpu.dot_dimension_numbers<[1], [0], [0], [1], [0, 0, 1, 1], [], []>, precision = #tpu.contract_precision<fp32>} : vector<128x24xf32>, vector<24x128xf32>, vector<128x128xf32> -> vector<128x128xf32>
    %18 = arith.mulf %16, %17 : vector<128x128xf32>
    %cst_10 = arith.constant 1.000000e+00 : f32
    %19 = vector.broadcast %cst_10 : f32 to vector<1x128xf32>
    %cst_11 = arith.constant dense<0.000000e+00> : vector<1x128xf32>
    %20 = tpu.matmul %19, %18, %cst_11 {dimension_numbers = #tpu.dot_dimension_numbers<[1], [0], [0], [1], [0, 0, 1, 1], [], []>, precision = #tpu.contract_precision<fp32>} : vector<1x128xf32>, vector<128x128xf32>, vector<1x128xf32> -> vector<1x128xf32>
    %21 = vector.shape_cast %20 : vector<1x128xf32> to vector<1x1x128xf32>
    %c0_12 = arith.constant 0 : index
    %c0_13 = arith.constant 0 : index
    %c0_14 = arith.constant 0 : index
    %22 = vector.load %arg5[%c0_12, %c0_13, %c0_14] : memref<1x1x128xf32, #tpu.memory_space<vmem>>, vector<1x1x128xf32>
    tpu.vector_store %arg5[%c0_12, %c0_13, %c0_14], %21 {strides = array<i32>} : memref<1x1x128xf32, #tpu.memory_space<vmem>>, vector<1x1x128xf32>,
    return
  }
  func.func @transform_0(%arg0: i32) -> (i32, i32, i32) {
    %c0_i32 = arith.constant 0 : i32
    %c0_i32_0 = arith.constant 0 : i32
    %c0_i32_1 = arith.constant 0 : i32
    return %arg0, %c0_i32, %c0_i32_0 : i32, i32, i32
  }
  func.func @transform_1(%arg0: i32) -> (i32, i32, i32) {
    %c0_i32 = arith.constant 0 : i32
    %c0_i32_0 = arith.constant 0 : i32
    %c0_i32_1 = arith.constant 0 : i32
    return %arg0, %c0_i32, %c0_i32_0 : i32, i32, i32
  }
  func.func @transform_2(%arg0: i32) -> (i32, i32) {
    %c0_i32 = arith.constant 0 : i32
    %c0_i32_0 = arith.constant 0 : i32
    %c0_i32_1 = arith.constant 0 : i32
    return %c0_i32, %c0_i32_0 : i32, i32
  }
  func.func @transform_3(%arg0: i32) -> (i32, i32) {
    %c0_i32 = arith.constant 0 : i32
    %c0_i32_0 = arith.constant 0 : i32
    %c0_i32_1 = arith.constant 0 : i32
    return %c0_i32, %c0_i32_0 : i32, i32
  }
  func.func @transform_4(%arg0: i32) -> (i32, i32, i32) {
    %c0_i32 = arith.constant 0 : i32
    %c0_i32_0 = arith.constant 0 : i32
    %c0_i32_1 = arith.constant 0 : i32
    return %arg0, %c0_i32, %c0_i32_0 : i32, i32, i32
  }
}

</mosaic_0001>

<bundles_post_ra>
// kernel: value_lr_forward.1
= control target key start
LH: loop header
LB: loop body
LE: loop exit
PB: predicated region body
PF: predicated region fallthrough
CT: control target
= control target key end

     0   :  { %v19_v1 = vlaneseq  ;;  %v5587_v8 = vmov 1.0|1.0   ;;  %v5562_v13 = vmov 0.0   ;;  %vm1284_vm9 = vcmask 195584   ;;  %s5557_s2 = inlined_call_operand.vmem [shape: f32[32,128], index: 2, kind: input, shape index: {}]   ;;  %s5558_s0 = inlined_call_operand.vmem [shape: s32[1,1,128], index: 0, kind: input, shape index: {}]   ;;  %s5559_s1 = inlined_call_operand.vmem [shape: s32[1,1,128], index: 1, kind: input, shape index: {}]   ;;  %s5560_s3 = inlined_call_operand.vmem [shape: f32[128,24], index: 3, kind: input, shape index: {}]   ;;  %s5561_s4 = inlined_call_operand.vmem [shape: f32[1,1,128], index: 4, kind: output, shape index: {}]  }
   0x1   :  { %v53_v0 = vld [vmem:[%s5557_s2] sm:$0xff]  ;;  %v54_v2 = vld [vmem:[%s5557_s2 + $0x8] sm:$0xff]  ;;  %v55_v5 = vld [vmem:[%s5557_s2 + $0x10] sm:$0xff]  ;;  %vm105_vm11 = vcmask 261120   ;;  %vm4441_vm12 = vmmov 0  }
   0x2   :  { %73 = vxpose.xlu0.b32.start [1/4] (short) %v53_v0, 128  ;;  %v4473_v3 = vshrl.u32 %v19_v1, 7  ;;  %v3099_v6 = vld [vmem:[%s5558_s0] ss:$0 sm:$0xff]  ;;  %v56_v11 = vld [vmem:[%s5557_s2 + $0x18] sm:$0xff]  ;;  %v58_v45 = vld [vmem:[%s5560_s3 + $0x8] sm:$0xff] }
   0x3   :  { %v3104_v31 = vld [vmem:[%s5559_s1] ss:$0 sm:$0xff]  ;;  %v1289_v48 = vsel %vm1284_vm9, %v58_v45, 0  ;;  %v59_v53 = vld [vmem:[%s5560_s3 + $0x10] sm:$0xff]  ;;  %v60_v57 = vld [vmem:[%s5560_s3 + $0x18] sm:$0xff] }
   0x4   :  { %v4476_v4 = vadd.s32 8, %v4473_v3  ;;  %vm28_vm0 = vcmp.eq.s32.totalorder %v4473_v3, %v3099_v6  ;;  %v22_v9 = vadd.s32 16, %v4473_v3  ;;  %v23_v10 = vadd.s32 24, %v4473_v3  ;;  %v57_v43 = vld [vmem:[%s5560_s3] sm:$0xff]  ;;  %v68_v45 = vld [vmem:[%s5560_s3 + $0x58] sm:$0xff] }
   0x5   :  { %v3100_v14 = vsel %vm28_vm0, 1.0, %v5562_v13  ;;  %vm44_vm6 = vcmp.eq.s32.totalorder %v4473_v3, %v3104_v31  ;;  %v1286_v44 = vsel %vm1284_vm9, %v57_v43, 0  ;;  %v4592_v50 = vand.u32 4294901760, %v1289_v48  ;;  %v61_v63 = vld [vmem:[%s5560_s3 + $0x20] sm:$0xff]  ;;  %v62_v3 = vld [vmem:[%s5560_s3 + $0x28] sm:$0xff] }
   0x6   :  { %74 = vxpose.xlu0.b32.cont [2/4] (short) %v54_v2, 128  ;;  %vm29_vm1 = vcmp.eq.s32.totalorder %v4476_v4, %v3099_v6  ;;  %vm30_vm3 = vcmp.eq.s32.totalorder %v22_v9, %v3099_v6  ;;  %vm31_vm4 = vcmp.eq.s32.totalorder %v23_v10, %v3099_v6  ;;  %v4523_v16 = vsub.f32 %v3100_v14, %v3100_v14  ;;  %v63_v10 = vld [vmem:[%s5560_s3 + $0x30] sm:$0xff] }
   0x7   :  { %vm4490_vm2 = vmpackc.low %vm29_vm1, %vm28_vm0  ;;  %v3101_v15 = vsel %vm29_vm1, 1.0, %v5562_v13  ;;  %v3102_v25 = vsel %vm30_vm3, 1.0, %v5562_v13  ;;  %v3103_v26 = vsel %vm31_vm4, 1.0, %v5562_v13  ;;  %vm45_vm7 = vcmp.eq.s32.totalorder %v4476_v4, %v3104_v31  ;;  %5644 = vst [vmem:[#allocation3_spill] sm:$0xff] %v4592_v50 }
   0x8   :  { %4048 = vmatprep.subr.msk.bf16.mxu0 %vm4490_vm2, %v5587_v8  ;;  %vm4507_vm5 = vmpackc.low %vm31_vm4, %vm30_vm3  ;;  %v4525_v17 = vsub.f32 %v3101_v15, %v3101_v15  ;;  %v5585_v18 = vand.u32 4294901760, %v4523_v16  ;;  %v4542_v27 = vsub.f32 %v3102_v25, %v3102_v25  ;;  %v4544_v28 = vsub.f32 %v3103_v26, %v3103_v26  ;;  %v64_v15 = vld [vmem:[%s5560_s3 + $0x38] sm:$0xff]  ;;  %v65_v25 = vld [vmem:[%s5560_s3 + $0x40] sm:$0xff] }
   0x9   :  { %4050 = vmatpush3.bf16.msk.msra.mxu0 %vm4490_vm2, %v5587_v8  ;;  %v3105_v34 = vsel %vm44_vm6, 1.0, %v5562_v13  ;;  %v3106_v35 = vsel %vm45_vm7, 1.0, %v5562_v13  ;;  %vm4573_vm8 = vcmp.eq.s32.totalorder %v22_v9, %v3104_v31  ;;  %v4587_v47 = vand.u32 4294901760, %v1286_v44  ;;  %vm4598_vm10 = vmpackc.low %vm45_vm7, %vm44_vm6 }
   0xa   :  { %75 = vxpose.xlu0.b32.cont [3/4] (short) %v55_v5, 128  ;;  %4052 = vmatprep.subr.msk.bf16.mxu0 %vm4507_vm5, %v5587_v8  ;;  %v5584_v19 = vand.u32 4294901760, %v4525_v17  ;;  %v387_v20 = vsub.f32 %v4523_v16, %v5585_v18  ;;  %v5580_v29 = vand.u32 4294901760, %v4542_v27  ;;  %v5575_v30 = vand.u32 4294901760, %v4544_v28 }
   0xb   :  { %v4565_v36 = vsub.f32 %v3105_v34, %v3105_v34  ;;  %v4567_v37 = vsub.f32 %v3106_v35, %v3106_v35  ;;  %v3107_v46 = vsel %vm4573_vm8, 1.0, %v5562_v13  ;;  %5643 = vst [vmem:[#allocation2_spill] sm:$0xff] %v4587_v47  ;;  %v4603_v52 = vsub.f32 %v1286_v44, %v4587_v47 }
   0xc   :  { %v394_v21 = vsub.f32 %v4525_v17, %v5584_v19  ;;  %v388_v22 = vand.u32 4294901760, %v387_v20  ;;  %v401_v32 = vsub.f32 %v4542_v27, %v5580_v29  ;;  %v408_v33 = vsub.f32 %v4544_v28, %v5575_v30 }
   0xd   :  { %4054 = vmatpush3.bf16.msk.msra.mxu0 %vm4507_vm5, %v5587_v8  ;;  %v4103_v40 = vpack.c.bf16 %v4567_v37, %v4565_v36  ;;  %v4590_v49 = vsub.f32 %v3107_v46, %v3107_v46  ;;  %v4611_v54 = vpack.c.bf16 %v4525_v17, %v4523_v16  ;;  %v4614_v55 = vsub.f32 %v1289_v48, %v4592_v50 }
   0xe   :  { %76 = vxpose.xlu0.b32.end [4/4] (short) %v56_v11, 128  ;;  %v395_v23 = vand.u32 4294901760, %v394_v21  ;;  %v402_v38 = vand.u32 4294901760, %v401_v32  ;;  %v409_v39 = vand.u32 4294901760, %v408_v33  ;;  %v1292_v56 = vsel %vm1284_vm9, %v59_v53, 0  ;;  %3723 = vmatprep.mubr.f32.mxu1 %v4603_v52  ;;  %v66_v32 = vld [vmem:[%s5560_s3 + $0x48] sm:$0xff] }
   0xf   :  { %4104 = vmatprep.subr.bf16.mxu1 %v4103_v40  ;;  %v4622_v58 = vand.u32 4294901760, %v1292_v56  ;;  %v1295_v59 = vsel %vm1284_vm9, %v60_v57, 0  ;;  %v1413_v60 = vand.u32 4294901760, %v4614_v55  ;;  %v1298_v2 = vsel %vm1284_vm9, %v61_v63, 0  ;;  %v69_v57 = vld [vmem:[%s5560_s3 + $0x60] sm:$0xff] }
  0x10   :  { %v4535_v24 = vpack.c.bf16 %v395_v23, %v388_v22  ;;  %v4571_v41 = vpack.c.bf16 %v409_v39, %v402_v38  ;;  %4106 = vmatpush3.bf16.msra.mxu1 %v4103_v40  ;;  %v4627_v61 = vand.u32 4294901760, %v1295_v59  ;;  %v4654_v4 = vand.u32 4294901760, %v1298_v2  ;;  %v67_v39 = vld [vmem:[%s5560_s3 + $0x50] sm:$0xff] }
  0x11   :  { %3721 = vmatprep.subr.mxu1 %v4590_v49  ;;  %5647 = vst [vmem:[#allocation4_spill] sm:$0xff] %v4622_v58  ;;  %v4633_v62 = vsub.f32 %v1292_v56, %v4622_v58  ;;  %v4644_v0 = vsub.f32 %v4614_v55, %v1413_v60  ;;  %v1301_v5 = vsel %vm1284_vm9, %v62_v3, 0  ;;  %v1304_v14 = vsel %vm1284_vm9, %v63_v10, 0 }
  0x12   :  { %4056 = vmatprep.subr.bf16.mxu0 %v4535_v24  ;;  %5648 = vst [vmem:[#allocation5_spill] sm:$0xff] %v4627_v61  ;;  %v4647_v1 = vsub.f32 %v1295_v59, %v4627_v61  ;;  %5649 = vst [vmem:[#allocation6_spill] sm:$0xff] %v4654_v4  ;;  %v4658_v6 = vand.u32 4294901760, %v1301_v5  ;;  %v4661_v9 = vsub.f32 %v1298_v2, %v4654_v4  ;;  %v4674_v20 = vand.u32 4294901760, %v1304_v14  ;;  %v70_v2 = vld [vmem:[%s5560_s3 + $0x68] sm:$0xff] }
  0x13   :  { %v1307_v21 = vsel %vm1284_vm9, %v64_v15, 0  ;;  %v1310_v31 = vsel %vm1284_vm9, %v65_v25, 0  ;;  %v1313_v34 = vsel %vm1284_vm9, %v66_v32, 0  ;;  %v4708_v40 = vpack.c.bf16 %v4544_v28, %v4542_v27  ;;  %v71_v15 = vld [vmem:[%s5560_s3 + $0x70] sm:$0xff] }
  0x14   :  { %3722 = vmatpush3.msra.mxu1 %v4590_v49  ;;  %5650 = vst [vmem:[#allocation7_spill] sm:$0xff] %v4658_v6  ;;  %5651 = vst [vmem:[#allocation8_spill] sm:$0xff] %v4661_v9  ;;  %v4667_v11 = vsub.f32 %v1301_v5, %v4658_v6  ;;  %v4678_v22 = vand.u32 4294901760, %v1307_v21  ;;  %v4681_v23 = vsub.f32 %v1304_v14, %v4674_v20  ;;  %v4694_v33 = vand.u32 4294901760, %v1310_v31 }
  0x15   :  { %3724 = vmatmul.mubr.f32.vlgmr.msra.gmra.mrb[0].mxu1 %v4614_v55  ;;  %4108 = vmatprep.subr.msk.bf16.mxu1 %vm4598_vm10, %v5587_v8  ;;  %5653 = vst [vmem:[#allocation10_spill] sm:$0xff] %v4674_v20  ;;  %v4698_v35 = vand.u32 4294901760, %v1313_v34  ;;  %v1316_v44 = vsel %vm1284_vm9, %v67_v39, 0  ;;  %v1319_v48 = vsel %vm1284_vm9, %v68_v45, 0  ;;  %v1322_v63 = vsel %vm1284_vm9, %v69_v57, 0 }
  0x16   :  { %4110 = vmatpush3.bf16.msk.msra.mxu1 %vm4598_vm10, %v5587_v8  ;;  %3726 = vmatprep.mubr.f32.mxu1 %v4633_v62  ;;  %5652 = vst [vmem:[#allocation9_spill] sm:$0xff] %v4667_v11  ;;  %5654 = vst [vmem:[#allocation11_spill] sm:$0xff] %v4678_v22  ;;  %v4687_v26 = vsub.f32 %v1307_v21, %v4678_v22  ;;  %v4701_v38 = vsub.f32 %v1310_v31, %v4694_v33  ;;  %v4718_v46 = vand.u32 4294901760, %v1316_v44  ;;  %v72_v31 = vld [vmem:[%s5560_s3 + $0x78] sm:$0xff]  ;;  %v5592_v57 = vmov 1.0  }
  0x17   :  { %5655 = vst [vmem:[#allocation12_spill] sm:$0xff] %v4681_v23  ;;  %5657 = vst [vmem:[#allocation14_spill] sm:$0xff] %v4694_v33  ;;  %v4711_v43 = vsub.f32 %v1313_v34, %v4698_v35  ;;  %v4722_v53 = vand.u32 4294901760, %v1319_v48  ;;  %v4738_v3 = vand.u32 4294901760, %v1322_v63  ;;  %v1325_v5 = vsel %vm1284_vm9, %v70_v2, 0  ;;  %3751 = vmatprep.subr.msk.mxu1 %vm4573_vm8, %v5592_v57 }
  0x18   :  { %5656 = vst [vmem:[#allocation13_spill] sm:$0xff] %v4687_v26  ;;  %5658 = vst [vmem:[#allocation15_spill] sm:$0xff] %v4701_v38  ;;  %v4725_v56 = vsub.f32 %v1316_v44, %v4718_v46  ;;  %v4742_v10 = vand.u32 4294901760, %v1325_v5  ;;  %v1328_v25 = vsel %vm1284_vm9, %v71_v15, 0  ;;  %v1331_v34 = vsel %vm1284_vm9, %v72_v31, 0 }
  0x19   :  { %3727 = vmatmul.mubr.f32.gmra.mrb[2].mxu1 %v4647_v1  ;;  %5659 = vst [vmem:[#allocation16_spill] sm:$0xff] %v4711_v43  ;;  %v4731_v59 = vsub.f32 %v1319_v48, %v4722_v53  ;;  %v4745_v14 = vsub.f32 %v1322_v63, %v4738_v3  ;;  %v4758_v32 = vand.u32 4294901760, %v1328_v25  ;;  %v4762_v39 = vand.u32 4294901760, %v1331_v34 }
  0x1a   :  { %3729 = vmatprep.mubr.f32.mxu1 %v4661_v9  ;;  %5660 = vst [vmem:[#allocation17_spill] sm:$0xff] %v4725_v56  ;;  %v4751_v21 = vsub.f32 %v1325_v5, %v4742_v10  ;;  %v5574_v48 = vand.u32 4294901760, %v4603_v52  ;;  %3752 = vmatpush3.msk.msra.mxu1 %vm4573_vm8, %v5592_v57  ;;  %v5573_v63 = vand.u32 4294901760, %v4633_v62  ;;  %v5570_v2 = vand.u32 4294901760, %v4647_v1 }
  0x1b   :  { %5661 = vst [vmem:[#allocation18_spill] sm:$0xff] %v4731_v59  ;;  %5662 = vst [vmem:[#allocation19_spill] sm:$0xff] %v4745_v14  ;;  %v4765_v44 = vsub.f32 %v1328_v25, %v4758_v32  ;;  %v4768_v45 = vsub.f32 %v1331_v34, %v4762_v39  ;;  %v5569_v5 = vand.u32 4294901760, %v4661_v9  ;;  %v5566_v15 = vand.u32 4294901760, %v4667_v11 }
  0x1c   :  { %5663 = vst [vmem:[#allocation20_spill] sm:$0xff] %v4751_v21  ;;  %v5565_v55 = vand.u32 4294901760, %v4681_v23  ;;  %v5567_v25 = vand.u32 4294901760, %v4701_v38  ;;  %v5568_v31 = vand.u32 4294901760, %v4711_v43  ;;  %v5572_v34 = vand.u32 4294901760, %v4725_v56 }
  0x1d   :  { %3730 = vmatmul.mubr.f32.gmra.mrb[4].mxu1 %v4667_v11  ;;  %5664 = vst [vmem:[#allocation21_spill] sm:$0xff] %v4765_v44  ;;  %5665 = vst [vmem:[#allocation22_spill] sm:$0xff] %v4768_v45  ;;  %v5571_v13 = vand.u32 4294901760, %v4731_v59  ;;  %v5581_v30 = vand.u32 4294901760, %v4768_v45  ;;  %v5686_v7 = vand.u32 4294901760, %v4565_v36  ;;  %v5690_v42 = vand.u32 4294901760, %v4633_v62 }
  0x1e   :  { %3732 = vmatprep.mubr.f32.mxu1 %v4681_v23 }
  0x1f   :  { %v1565_v12 = vsub.f32 %v4565_v36, %v5686_v7  ;;  %v1424_v51 = vsub.f32 %v4633_v62, %v5690_v42 }
  0x21   :  { %3733 = vmatmul.mubr.f32.gmra.mrb[6].mxu1 %v4687_v26 }
  0x22   :  { %3735 = vmatprep.mubr.f32.mxu1 %v4701_v38 }
  0x25   :  { %3736 = vmatmul.mubr.f32.gmra.mrb[8].mxu1 %v4711_v43 }
  0x26   :  { %3738 = vmatprep.mubr.f32.mxu1 %v4725_v56 }
  0x29   :  { %3739 = vmatmul.mubr.f32.gmra.mrb[10].mxu1 %v4731_v59 }
  0x2a   :  { %3741 = vmatprep.mubr.f32.mxu1 %v4745_v14 }
  0x2d   :  { %3742 = vmatmul.mubr.f32.gmra.mrb[12].mxu1 %v4751_v21 }
  0x2e   :  { %3744 = vmatprep.mubr.f32.mxu1 %v4765_v44 }
  0x31   :  { %3745 = vmatmul.mubr.f32.gmra.mrb[14].mxu1 %v4768_v45 }
  0x32   :  { %3753 = vmatprep.mubr.f32.mxu1 %v5574_v48 }
  0x35   :  { %3754 = vmatmul.mubr.f32.vlgmr.msra.gmra.mrb[0].mxu1 %v1413_v60  ;;  %v5564_v60 = vand.u32 4294901760, %v4687_v26 }
  0x36   :  { %3756 = vmatprep.mubr.f32.mxu1 %v5573_v63  ;;  %v5582_v63 = vand.u32 4294901760, %v4765_v44 }
  0x39   :  { %3757 = vmatmul.mubr.f32.gmra.mrb[2].mxu1 %v5570_v2 }
  0x3a   :  { %3759 = vmatprep.mubr.f32.mxu1 %v5569_v5  ;;  %v5578_v5 = vand.u32 4294901760, %v4567_v37 }
  0x3d   :  { %3760 = vmatmul.mubr.f32.gmra.mrb[4].mxu1 %v5566_v15 }
  0x3e   :  { %3762 = vmatprep.mubr.f32.mxu1 %v5565_v55  ;;  %v5576_v55 = vand.u32 4294901760, %v4745_v14 }
  0x41   :  { %3763 = vmatmul.mubr.f32.gmra.mrb[6].mxu1 %v5564_v60 }
  0x42   :  { %3765 = vmatprep.mubr.f32.mxu1 %v5567_v25  ;;  %v5577_v25 = vand.u32 4294901760, %v4751_v21 }
  0x45   :  { %3766 = vmatmul.mubr.f32.gmra.mrb[8].mxu1 %v5568_v31  ;;  %v5579_v31 = vand.u32 4294901760, %v4565_v36 }
  0x46   :  { %3768 = vmatprep.mubr.f32.mxu1 %v5572_v34 }
  0x49   :  { %3769 = vmatmul.mubr.f32.gmra.mrb[10].mxu1 %v5571_v13  ;;  %v4111_v13 = vpack.c.bf16 %v5578_v5, %v5579_v31 }
  0x4a   :  { %3771 = vmatprep.mubr.f32.mxu1 %v5576_v55 }
  0x4b   :  { %4112 = vmatprep.subr.bf16.mxu1 %v4111_v13 }
  0x4c   :  { %4114 = vmatpush3.bf16.msra.mxu1 %v4111_v13 }
  0x4d   :  { %3772 = vmatmul.mubr.f32.gmra.mrb[12].mxu1 %v5577_v25 }
  0x4e   :  { %3774 = vmatprep.mubr.f32.mxu1 %v5582_v63 }
  0x51   :  { %3775 = vmatmul.mubr.f32.gmra.mrb[14].mxu1 %v5581_v30 }
  0x52   :  { %3783 = vmatprep.mubr.f32.mxu1 %v4587_v47 }
  0x82   :  { %v89_v60 = vpop.trf.xlu0 }
  0x83   :  { %v107_v15 = vsel %vm105_vm11, %v89_v60, 0 }
  0x84   :  { %v4818_v2 = vand.u32 4294901760, %v107_v15 }
  0x86   :  { %v4829_v60 = vsub.f32 %v107_v15, %v4818_v2  ;;  %v90_v34 = vpop.trf.xlu0  ;;  %v4842_v15 = vand.u32 4294901760, %v4590_v49 }
  0x87   :  { %v110_v48 = vsel %vm105_vm11, %v90_v34, 0 }
  0x88   :  { %v4834_v55 = vand.u32 4294901760, %v110_v48  ;;  %v5583_v25 = vand.u32 4294901760, %v4829_v60  ;;  %3781 = vmatprep.subr.mxu1 %v4842_v15 }
  0x89   :  { %3782 = vmatpush3.msra.mxu1 %v4842_v15 }
  0x8a   :  { %v4845_v5 = vsub.f32 %v110_v48, %v4834_v55  ;;  %v91_v34 = vpop.trf.xlu0  ;;  %v226_v31 = vsub.f32 %v4829_v60, %v5583_v25  ;;  %3784 = vmatmul.mubr.f32.vlgmr.msra.gmra.mrb[0].mxu1 %v4592_v50  ;;  %4116 = vmatprep.subr.msk.bf16.mxu1 %vm4598_vm10, %v5587_v8 }
  0x8b   :  { %v113_v29 = vsel %vm105_vm11, %v91_v34, 0  ;;  %3786 = vmatprep.mubr.f32.mxu1 %v4622_v58  ;;  %4118 = vmatpush3.bf16.msk.msra.mxu1 %vm4598_vm10, %v5587_v8 }
  0x8c   :  { %v5586_v13 = vand.u32 4294901760, %v4845_v5  ;;  %v4854_v30 = vand.u32 4294901760, %v113_v29  ;;  %v227_v63 = vand.u32 4294901760, %v226_v31  ;;  %3811 = vmatprep.subr.msk.mxu1 %vm4573_vm8, %v5592_v57 }
  0x8e   :  { %v4862_v48 = vsub.f32 %v113_v29, %v4854_v30  ;;  %3473 = vmatprep.mubr.f32.mxu0 %v227_v63  ;;  %v92_v34 = vpop.trf.xlu0  ;;  %v236_v25 = vsub.f32 %v4845_v5, %v5586_v13  ;;  %3787 = vmatmul.mubr.f32.gmra.mrb[2].mxu1 %v4627_v61 }
  0x8f   :  { %v116_v31 = vsel %vm105_vm11, %v92_v34, 0  ;;  %3789 = vmatprep.mubr.f32.mxu1 %v4654_v4  ;;  %3812 = vmatpush3.msk.msra.mxu1 %vm4573_vm8, %v5592_v57 }
  0x90   :  { %v5591_v19 = vand.u32 4294901760, %v4862_v48  ;;  %v4873_v18 = vand.u32 4294901760, %v116_v31  ;;  %v237_v29 = vand.u32 4294901760, %v236_v25 }
  0x92   :  { %v4880_v63 = vsub.f32 %v116_v31, %v4873_v18  ;;  %v93_v13 = vpop.trf.xlu0  ;;  %3474 = vmatmul.mubr.f32.vlgmr.msra.gmra.mrb[0].mxu0 %v237_v29  ;;  %v246_v34 = vsub.f32 %v4862_v48, %v5591_v19  ;;  %3790 = vmatmul.mubr.f32.gmra.mrb[4].mxu1 %v4658_v6 }
  0x93   :  { %v119_v8 = vsel %vm105_vm11, %v93_v13, 0  ;;  %4058 = vmatpush3.bf16.msra.mxu0 %v4535_v24  ;;  %3792 = vmatprep.mubr.f32.mxu1 %v4674_v20 }
  0x94   :  { %v5596_v25 = vand.u32 4294901760, %v4880_v63  ;;  %v4892_v31 = vand.u32 4294901760, %v119_v8  ;;  %v247_v45 = vand.u32 4294901760, %v246_v34  ;;  %4060 = vmatprep.subr.bf16.mxu0 %v4571_v41 }
  0x96   :  { %v4897_v29 = vsub.f32 %v119_v8, %v4892_v31  ;;  %v94_v19 = vpop.trf.xlu0  ;;  %3476 = vmatprep.mubr.f32.mxu0 %v247_v45  ;;  %v256_v24 = vsub.f32 %v4880_v63, %v5596_v25  ;;  %3793 = vmatmul.mubr.f32.gmra.mrb[6].mxu1 %v4678_v22 }
  0x97   :  { %v122_v13 = vsel %vm105_vm11, %v94_v19, 0  ;;  %4062 = vmatpush3.bf16.msra.mxu0 %v4571_v41  ;;  %3795 = vmatprep.mubr.f32.mxu1 %v4694_v33 }
  0x98   :  { %v5601_v34 = vand.u32 4294901760, %v4897_v29  ;;  %v4906_v57 = vand.u32 4294901760, %v122_v13  ;;  %v257_v44 = vand.u32 4294901760, %v256_v24  ;;  %4064 = vmatprep.subr.bf16.mxu0 %v4611_v54 }
  0x9a   :  { %v4911_v8 = vsub.f32 %v122_v13, %v4906_v57  ;;  %v95_v45 = vpop.trf.xlu0  ;;  %3477 = vmatmul.mubr.f32.gmra.mrb[2].mxu0 %v257_v44  ;;  %v266_v19 = vsub.f32 %v4897_v29, %v5601_v34  ;;  %3796 = vmatmul.mubr.f32.gmra.mrb[8].mxu1 %v4698_v35 }
  0x9b   :  { %v125_v41 = vsel %vm105_vm11, %v95_v45, 0  ;;  %3798 = vmatprep.mubr.f32.mxu1 %v4718_v46 }
  0x9c   :  { %v5606_v25 = vand.u32 4294901760, %v4911_v8  ;;  %v4919_v24 = vand.u32 4294901760, %v125_v41  ;;  %v267_v21 = vand.u32 4294901760, %v266_v19 }
  0x9e   :  { %v4923_v13 = vsub.f32 %v125_v41, %v4919_v24  ;;  %v96_v14 = vpop.trf.xlu0  ;;  %3479 = vmatprep.mubr.f32.mxu0 %v267_v21  ;;  %v276_v44 = vsub.f32 %v4911_v8, %v5606_v25  ;;  %3799 = vmatmul.mubr.f32.gmra.mrb[10].mxu1 %v4722_v53 }
  0x9f   :  { %v128_v45 = vsel %vm105_vm11, %v96_v14, 0  ;;  %3801 = vmatprep.mubr.f32.mxu1 %v4738_v3 }
  0xa0   :  { %v5611_v34 = vand.u32 4294901760, %v4923_v13  ;;  %v4931_v59 = vand.u32 4294901760, %v128_v45  ;;  %v277_v19 = vand.u32 4294901760, %v276_v44 }
  0xa2   :  { %v4935_v41 = vsub.f32 %v128_v45, %v4931_v59  ;;  %v97_v56 = vpop.trf.xlu0  ;;  %3480 = vmatmul.mubr.f32.gmra.mrb[4].mxu0 %v277_v19  ;;  %v286_v21 = vsub.f32 %v4923_v13, %v5611_v34  ;;  %3802 = vmatmul.mubr.f32.gmra.mrb[12].mxu1 %v4742_v10 }
  0xa3   :  { %v131_v14 = vsel %vm105_vm11, %v97_v56, 0  ;;  %3804 = vmatprep.mubr.f32.mxu1 %v4758_v32 }
  0xa4   :  { %v5616_v25 = vand.u32 4294901760, %v4935_v41  ;;  %v4943_v43 = vand.u32 4294901760, %v131_v14  ;;  %v287_v44 = vand.u32 4294901760, %v286_v21 }
  0xa6   :  { %v4947_v45 = vsub.f32 %v131_v14, %v4943_v43  ;;  %v98_v38 = vpop.trf.xlu0  ;;  %3482 = vmatprep.mubr.f32.mxu0 %v287_v44  ;;  %v296_v19 = vsub.f32 %v4935_v41, %v5616_v25  ;;  %3805 = vmatmul.mubr.f32.gmra.mrb[14].mxu1 %v4762_v39 }
  0xa7   :  { %v134_v56 = vsel %vm105_vm11, %v98_v38, 0  ;;  %3813 = vmatprep.mubr.f32.mxu1 %v4587_v47 }
  0xa8   :  { %v5621_v34 = vand.u32 4294901760, %v4947_v45  ;;  %v4955_v26 = vand.u32 4294901760, %v134_v56  ;;  %v297_v21 = vand.u32 4294901760, %v296_v19 }
  0xaa   :  { %v4959_v14 = vsub.f32 %v134_v56, %v4955_v26  ;;  %v99_v23 = vpop.trf.xlu0  ;;  %3483 = vmatmul.mubr.f32.gmra.mrb[6].mxu0 %v297_v21  ;;  %v306_v44 = vsub.f32 %v4947_v45, %v5621_v34  ;;  %3814 = vmatmul.mubr.f32.vlgmr.msra.gmra.mrb[0].mxu1 %v4592_v50 }
  0xab   :  { %v137_v38 = vsel %vm105_vm11, %v99_v23, 0  ;;  %3816 = vmatprep.mubr.f32.mxu1 %v4622_v58 }
  0xac   :  { %v5624_v25 = vand.u32 4294901760, %v4959_v14  ;;  %v4967_v11 = vand.u32 4294901760, %v137_v38  ;;  %v307_v19 = vand.u32 4294901760, %v306_v44 }
  0xae   :  { %v4971_v56 = vsub.f32 %v137_v38, %v4967_v11  ;;  %v100_v9 = vpop.trf.xlu0  ;;  %3485 = vmatprep.mubr.f32.mxu0 %v307_v19  ;;  %v316_v21 = vsub.f32 %v4959_v14, %v5624_v25  ;;  %3817 = vmatmul.mubr.f32.gmra.mrb[2].mxu1 %v4627_v61 }
  0xaf   :  { %v140_v23 = vsel %vm105_vm11, %v100_v9, 0  ;;  %3819 = vmatprep.mubr.f32.mxu1 %v4654_v4 }
  0xb0   :  { %v5627_v34 = vand.u32 4294901760, %v4971_v56  ;;  %v4979_v47 = vand.u32 4294901760, %v140_v23  ;;  %v317_v44 = vand.u32 4294901760, %v316_v21 }
  0xb2   :  { %v4983_v38 = vsub.f32 %v140_v23, %v4979_v47  ;;  %v101_v50 = vpop.trf.xlu0  ;;  %3486 = vmatmul.mubr.f32.gmra.mrb[8].mxu0 %v317_v44  ;;  %v326_v19 = vsub.f32 %v4971_v56, %v5627_v34  ;;  %3820 = vmatmul.mubr.f32.gmra.mrb[4].mxu1 %v4658_v6 }
  0xb3   :  { %v143_v9 = vsel %vm105_vm11, %v101_v50, 0  ;;  %3822 = vmatprep.mubr.f32.mxu1 %v4674_v20 }
  0xb4   :  { %v5630_v25 = vand.u32 4294901760, %v4983_v38  ;;  %v4991_v58 = vand.u32 4294901760, %v143_v9  ;;  %v327_v21 = vand.u32 4294901760, %v326_v19 }
  0xb6   :  { %v4995_v23 = vsub.f32 %v143_v9, %v4991_v58  ;;  %v102_v61 = vpop.trf.xlu0  ;;  %3488 = vmatprep.mubr.f32.mxu0 %v327_v21  ;;  %v336_v44 = vsub.f32 %v4983_v38, %v5630_v25  ;;  %3823 = vmatmul.mubr.f32.gmra.mrb[6].mxu1 %v4678_v22 }
  0xb7   :  { %v146_v50 = vsel %vm105_vm11, %v102_v61, 0  ;;  %3825 = vmatprep.mubr.f32.mxu1 %v4694_v33 }
  0xb8   :  { %v5633_v34 = vand.u32 4294901760, %v4995_v23  ;;  %v5003_v4 = vand.u32 4294901760, %v146_v50  ;;  %v337_v19 = vand.u32 4294901760, %v336_v44 }
  0xba   :  { %v5007_v9 = vsub.f32 %v146_v50, %v5003_v4  ;;  %v103_v6 = vpop.trf.xlu0  ;;  %3489 = vmatmul.mubr.f32.gmra.mrb[10].mxu0 %v337_v19  ;;  %v346_v21 = vsub.f32 %v4995_v23, %v5633_v34  ;;  %3826 = vmatmul.mubr.f32.gmra.mrb[8].mxu1 %v4698_v35 }
  0xbb   :  { %v149_v61 = vsel %vm105_vm11, %v103_v6, 0  ;;  %3828 = vmatprep.mubr.f32.mxu1 %v4718_v46 }
  0xbc   :  { %v5635_v25 = vand.u32 4294901760, %v5007_v9  ;;  %v5015_v20 = vand.u32 4294901760, %v149_v61  ;;  %v347_v44 = vand.u32 4294901760, %v346_v21 }
  0xbe   :  { %v5019_v50 = vsub.f32 %v149_v61, %v5015_v20  ;;  %v104_v22 = vpop.trf.xlu0  ;;  %3491 = vmatprep.mubr.f32.mxu0 %v347_v44  ;;  %v356_v19 = vsub.f32 %v5007_v9, %v5635_v25  ;;  %3829 = vmatmul.mubr.f32.gmra.mrb[10].mxu1 %v4722_v53 }
  0xbf   :  { %v152_v6 = vsel %vm105_vm11, %v104_v22, 0  ;;  %3831 = vmatprep.mubr.f32.mxu1 %v4738_v3 }
  0xc0   :  { %v365_v34 = vand.u32 4294901760, %v5019_v50  ;;  %v5027_v33 = vand.u32 4294901760, %v152_v6  ;;  %v357_v21 = vand.u32 4294901760, %v356_v19 }
  0xc2   :  { %v5031_v61 = vsub.f32 %v152_v6, %v5027_v33  ;;  %3492 = vmatmul.mubr.f32.gmra.mrb[12].mxu0 %v357_v21  ;;  %v366_v44 = vsub.f32 %v5019_v50, %v365_v34  ;;  %3832 = vmatmul.mubr.f32.gmra.mrb[12].mxu1 %v4742_v10  ;;  %v5666_v21 = vmov 1.0|1.0  }
  0xc3   :  { %3834 = vmatprep.mubr.f32.mxu1 %v4758_v32 }
  0xc4   :  { %v5636_v25 = vand.u32 4294901760, %v5031_v61  ;;  %v367_v22 = vand.u32 4294901760, %v366_v44 }
  0xc6   :  { %3494 = vmatprep.mubr.f32.mxu0 %v367_v22  ;;  %v376_v19 = vsub.f32 %v5031_v61, %v5636_v25  ;;  %3835 = vmatmul.mubr.f32.gmra.mrb[14].mxu1 %v4762_v39  ;;  %v5671_v22 = vand.u32 4294901760, %v4544_v28  ;;  %v5675_v25 = vand.u32 4294901760, %v4897_v29  ;;  %v5677_v28 = vand.u32 4294901760, %v4923_v13 }
  0xc8   :  { %v377_v6 = vand.u32 4294901760, %v376_v19 }
  0xca   :  { %3495 = vmatmul.mubr.f32.gmra.mrb[14].mxu0 %v377_v6  ;;  %v5672_v6 = vand.u32 4294901760, %v4845_v5 }
  0xcb   :  { %3505 = vmatprep.mubr.f32.mxu0 %v4818_v2 }
  0xce   :  { %3506 = vmatmul.mubr.f32.vlgmr.msra.gmra.mrb[0].mxu0 %v4834_v55 }
  0xcf   :  { %4066 = vmatpush3.bf16.msra.mxu0 %v4611_v54  ;;  %3508 = vmatprep.mubr.f32.mxu0 %v4854_v30  ;;  %v5667_v54 = vand.u32 4294901760, %v4523_v16  ;;  %v5669_v16 = vand.u32 4294901760, %v4829_v60 }
  0xd0   :  { %4068 = vmatprep.subr.bf16.mxu0 %v4708_v40 }
  0xd2   :  { %3509 = vmatmul.mubr.f32.gmra.mrb[2].mxu0 %v4873_v18 }
  0xd3   :  { %3511 = vmatprep.mubr.f32.mxu0 %v4892_v31  ;;  %4070 = vmatpush3.bf16.msra.mxu0 %v4708_v40  ;;  %v5668_v40 = vand.u32 4294901760, %v4525_v17  ;;  %v5670_v17 = vand.u32 4294901760, %v4542_v27  ;;  %v5676_v27 = vand.u32 4294901760, %v4911_v8 }
  0xd4   :  { %4072 = vmatprep.subr.msk.bf16.mxu0 %vm4490_vm2, %v5666_v21 }
  0xd5   :  { %v4079_v44 = vpack.c.bf16 %v5668_v40, %v5667_v54  ;;  %v4083_v19 = vpack.c.bf16 %v5671_v22, %v5670_v17  ;;  %v5673_v54 = vand.u32 4294901760, %v4862_v48  ;;  %v5674_v40 = vand.u32 4294901760, %v4880_v63 }
  0xd6   :  { %3512 = vmatmul.mubr.f32.gmra.mrb[4].mxu0 %v4906_v57 }
  0xd7   :  { %3514 = vmatprep.mubr.f32.mxu0 %v4919_v24 }
  0xda   :  { %3515 = vmatmul.mubr.f32.gmra.mrb[6].mxu0 %v4931_v59 }
  0xdb   :  { %3517 = vmatprep.mubr.f32.mxu0 %v4943_v43 }
  0xde   :  { %3518 = vmatmul.mubr.f32.gmra.mrb[8].mxu0 %v4955_v26 }
  0xdf   :  { %3520 = vmatprep.mubr.f32.mxu0 %v4967_v11 }
  0xe2   :  { %3521 = vmatmul.mubr.f32.gmra.mrb[10].mxu0 %v4979_v47 }
  0xe3   :  { %3523 = vmatprep.mubr.f32.mxu0 %v4991_v58 }
  0xe6   :  { %3524 = vmatmul.mubr.f32.gmra.mrb[12].mxu0 %v5003_v4 }
  0xe7   :  { %3526 = vmatprep.mubr.f32.mxu0 %v5015_v20 }
  0xea   :  { %3527 = vmatmul.mubr.f32.gmra.mrb[14].mxu0 %v5027_v33 }
  0xeb   :  { %3537 = vmatprep.mubr.f32.mxu0 %v4829_v60  ;;  %v5679_v60 = vand.u32 4294901760, %v4947_v45 }
  0xee   :  { %3538 = vmatmul.mubr.f32.vlgmr.msra.gmra.mrb[0].mxu0 %v4845_v5  ;;  %v5678_v5 = vand.u32 4294901760, %v4935_v41 }
  0xef   :  { %4074 = vmatpush3.bf16.msk.msra.mxu0 %vm4490_vm2, %v5666_v21  ;;  %3540 = vmatprep.mubr.f32.mxu0 %v4862_v48  ;;  %v5680_v48 = vand.u32 4294901760, %v4959_v14 }
  0xf0   :  { %4076 = vmatprep.subr.msk.bf16.mxu0 %vm4507_vm5, %v5666_v21 }
  0xf2   :  { %3541 = vmatmul.mubr.f32.gmra.mrb[2].mxu0 %v4880_v63  ;;  %v5681_v63 = vand.u32 4294901760, %v4971_v56 }
  0xf3   :  { %3543 = vmatprep.mubr.f32.mxu0 %v4897_v29  ;;  %4078 = vmatpush3.bf16.msk.msra.mxu0 %vm4507_vm5, %v5666_v21  ;;  %v5683_v29 = vand.u32 4294901760, %v4995_v23 }
  0xf4   :  { %4080 = vmatprep.subr.bf16.mxu0 %v4079_v44 }
  0xf6   :  { %3544 = vmatmul.mubr.f32.gmra.mrb[4].mxu0 %v4911_v8  ;;  %v5684_v8 = vand.u32 4294901760, %v5007_v9 }
  0xf7   :  { %3546 = vmatprep.mubr.f32.mxu0 %v4923_v13  ;;  %v5685_v13 = vand.u32 4294901760, %v5031_v61 }
  0xfa   :  { %3547 = vmatmul.mubr.f32.gmra.mrb[6].mxu0 %v4935_v41 }
  0xfb   :  { %3549 = vmatprep.mubr.f32.mxu0 %v4947_v45  ;;  %v1566_v45 = vand.u32 4294901760, %v1565_v12 }
  0xfe   :  { %3550 = vmatmul.mubr.f32.gmra.mrb[8].mxu0 %v4959_v14 }
  0xff   :  { %3552 = vmatprep.mubr.f32.mxu0 %v4971_v56  ;;  %v5688_v56 = vmov 1.0  }
 0x102   :  { %3553 = vmatmul.mubr.f32.gmra.mrb[10].mxu0 %v4983_v38 }
 0x103   :  { %3555 = vmatprep.mubr.f32.mxu0 %v4995_v23 }
 0x106   :  { %3556 = vmatmul.mubr.f32.gmra.mrb[12].mxu0 %v5007_v9  ;;  %v5700_v9 = vld [vmem:[#allocation15_spill] sm:$0xff] }
 0x107   :  { %3558 = vmatprep.mubr.f32.mxu0 %v5019_v50  ;;  %v5701_v50 = vand.u32 4294901760, %v5700_v9 }
 0x10a   :  { %3559 = vmatmul.mubr.f32.gmra.mrb[14].mxu0 %v5031_v61  ;;  %v1484_v61 = vsub.f32 %v5700_v9, %v5701_v50 }
 0x10b   :  { %3569 = vmatprep.mubr.f32.mxu0 %v5669_v16 }
 0x10c   :  { %v1485_v22 = vand.u32 4294901760, %v1484_v61  ;;  %v4440_v61 = vmov 0.0|0.0  }
 0x10d   :  { %4143 = vmatprep.subr.bf16.mxu1 %v4440_v61 }
 0x10e   :  { %3570 = vmatmul.mubr.f32.vlgmr.msra.gmra.mrb[0].mxu0 %v5672_v6 }
 0x10f   :  { %4082 = vmatpush3.bf16.msra.mxu0 %v4079_v44  ;;  %3572 = vmatprep.mubr.f32.mxu0 %v5673_v54  ;;  %v5702_v44 = vld [vmem:[#allocation16_spill] sm:$0xff] }
 0x110   :  { %4084 = vmatprep.subr.bf16.mxu0 %v4083_v19  ;;  %v5703_v16 = vand.u32 4294901760, %v5702_v44 }
 0x112   :  { %3573 = vmatmul.mubr.f32.gmra.mrb[2].mxu0 %v5674_v40  ;;  %v1494_v17 = vsub.f32 %v5702_v44, %v5703_v16 }
 0x113   :  { %3575 = vmatprep.mubr.f32.mxu0 %v5675_v25  ;;  %4086 = vmatpush3.bf16.msra.mxu0 %v4083_v19  ;;  %v5682_v25 = vand.u32 4294901760, %v4983_v38  ;;  %v5704_v19 = vld [vmem:[#allocation17_spill] sm:$0xff] }
 0x114   :  { %4088 = vmatprep.subr.msk.bf16.mxu0 %vm4490_vm2, %v5666_v21  ;;  %v5705_v6 = vand.u32 4294901760, %v5704_v19  ;;  %v1495_v40 = vand.u32 4294901760, %v1494_v17 }
 0x116   :  { %3576 = vmatmul.mubr.f32.gmra.mrb[4].mxu0 %v5676_v27  ;;  %v1504_v54 = vsub.f32 %v5704_v19, %v5705_v6  ;;  %v5706_v27 = vld [vmem:[#allocation18_spill] sm:$0xff] }
 0x117   :  { %3578 = vmatprep.mubr.f32.mxu0 %v5677_v28  ;;  %v5707_v28 = vand.u32 4294901760, %v5706_v27 }
 0x11a   :  { %3579 = vmatmul.mubr.f32.gmra.mrb[6].mxu0 %v5678_v5  ;;  %v1514_v5 = vsub.f32 %v5706_v27, %v5707_v28 }
 0x11b   :  { %3581 = vmatprep.mubr.f32.mxu0 %v5679_v60  ;;  %v1505_v60 = vand.u32 4294901760, %v1504_v54 }
 0x11e   :  { %3582 = vmatmul.mubr.f32.gmra.mrb[8].mxu0 %v5680_v48  ;;  %v5708_v48 = vld [vmem:[#allocation19_spill] sm:$0xff] }
 0x11f   :  { %3584 = vmatprep.mubr.f32.mxu0 %v5681_v63  ;;  %v5709_v63 = vand.u32 4294901760, %v5708_v48 }
 0x122   :  { %3585 = vmatmul.mubr.f32.gmra.mrb[10].mxu0 %v5682_v25  ;;  %v1524_v25 = vsub.f32 %v5708_v48, %v5709_v63 }
 0x123   :  { %3587 = vmatprep.mubr.f32.mxu0 %v5683_v29  ;;  %v1515_v29 = vand.u32 4294901760, %v1514_v5 }
 0x124   :  { %v1525_v12 = vand.u32 4294901760, %v1524_v25 }
 0x126   :  { %3588 = vmatmul.mubr.f32.gmra.mrb[12].mxu0 %v5684_v8  ;;  %v5710_v8 = vld [vmem:[#allocation20_spill] sm:$0xff] }
 0x127   :  { %3590 = vmatprep.mubr.f32.mxu0 %v365_v34  ;;  %v5687_v34 = vand.u32 4294901760, %v4567_v37 }
 0x129   :  { %v1572_v41 = vsub.f32 %v4567_v37, %v5687_v34  ;;  %v5712_v34 = vld [vmem:[#allocation21_spill] sm:$0xff] }
 0x12a   :  { %3591 = vmatmul.mubr.f32.gmra.mrb[14].mxu0 %v5685_v13  ;;  %v5711_v13 = vand.u32 4294901760, %v5710_v8 }
 0x12b   :  { %3601 = vmatprep.mubr.f32.mxu0 %v4818_v2  ;;  %v1573_v14 = vand.u32 4294901760, %v1572_v41  ;;  %v5713_v41 = vand.u32 4294901760, %v5712_v34 }
 0x12c   :  { %v1534_v7 = vsub.f32 %v5710_v8, %v5711_v13 }
 0x12d   :  { %v4099_v36 = vpack.c.bf16 %v1573_v14, %v1566_v45  ;;  %v1544_v45 = vsub.f32 %v5712_v34, %v5713_v41 }
 0x12e   :  { %3602 = vmatmul.mubr.f32.vlgmr.msra.gmra.mrb[0].mxu0 %v4834_v55 }
 0x12f   :  { %4090 = vmatpush3.bf16.msk.msra.mxu0 %vm4490_vm2, %v5666_v21  ;;  %3604 = vmatprep.mubr.f32.mxu0 %v4854_v30 }
 0x130   :  { %4092 = vmatprep.subr.msk.bf16.mxu0 %vm4507_vm5, %v5666_v21 }
 0x132   :  { %3605 = vmatmul.mubr.f32.gmra.mrb[2].mxu0 %v4873_v18 }
 0x133   :  { %3607 = vmatprep.mubr.f32.mxu0 %v4892_v31  ;;  %4094 = vmatpush3.bf16.msk.msra.mxu0 %vm4507_vm5, %v5666_v21 }
 0x134   :  { %4096 = vmatprep.subr.msk.bf16.mxu0 %vm4598_vm10, %v5666_v21 }
 0x136   :  { %3608 = vmatmul.mubr.f32.gmra.mrb[4].mxu0 %v4906_v57 }
 0x137   :  { %3610 = vmatprep.mubr.f32.mxu0 %v4919_v24 }
 0x13a   :  { %3611 = vmatmul.mubr.f32.gmra.mrb[6].mxu0 %v4931_v59 }
 0x13b   :  { %3613 = vmatprep.mubr.f32.mxu0 %v4943_v43 }
 0x13e   :  { %3614 = vmatmul.mubr.f32.gmra.mrb[8].mxu0 %v4955_v26 }
 0x13f   :  { %3616 = vmatprep.mubr.f32.mxu0 %v4967_v11 }
 0x142   :  { %3617 = vmatmul.mubr.f32.gmra.mrb[10].mxu0 %v4979_v47 }
 0x143   :  { %3619 = vmatprep.mubr.f32.mxu0 %v4991_v58 }
 0x146   :  { %3620 = vmatmul.mubr.f32.gmra.mrb[12].mxu0 %v5003_v4 }
 0x147   :  { %3622 = vmatprep.mubr.f32.mxu0 %v5015_v20 }
 0x14a   :  { %3623 = vmatmul.mubr.f32.gmra.mrb[14].mxu0 %v5027_v33 }
 0x14b   :  { %3633 = vmatprep.mubr.f32.mxu0 %v4818_v2 }
 0x14e   :  { %3634 = vmatmul.mubr.f32.vlgmr.msra.gmra.mrb[0].mxu0 %v4834_v55 }
 0x14f   :  { %4098 = vmatpush3.bf16.msk.msra.mxu0 %vm4598_vm10, %v5666_v21  ;;  %3636 = vmatprep.mubr.f32.mxu0 %v4854_v30 }
 0x150   :  { %3661 = vmatprep.subr.msk.mxu0 %vm4573_vm8, %v5688_v56 }
 0x152   :  { %3637 = vmatmul.mubr.f32.gmra.mrb[2].mxu0 %v4873_v18  ;;  %v5689_v18 = vand.u32 4294901760, %v4603_v52 }
 0x153   :  { %3639 = vmatprep.mubr.f32.mxu0 %v4892_v31  ;;  %3662 = vmatpush3.msk.msra.mxu0 %vm4573_vm8, %v5688_v56  ;;  %v5698_v31 = vld [vmem:[#allocation13_spill] sm:$0xff] }
 0x154   :  { %4100 = vmatprep.subr.bf16.mxu0 %v4099_v36  ;;  %v1404_v30 = vsub.f32 %v4603_v52, %v5689_v18  ;;  %v1535_v18 = vand.u32 4294901760, %v1534_v7 }
 0x156   :  { %3640 = vmatmul.mubr.f32.gmra.mrb[4].mxu0 %v4906_v57  ;;  %v1405_v37 = vand.u32 4294901760, %v1404_v30  ;;  %v5694_v57 = vld [vmem:[#allocation9_spill] sm:$0xff]  ;;  %v5714_v30 = vld [vmem:[#allocation22_spill] sm:$0xff] }
 0x157   :  { %3642 = vmatprep.mubr.f32.mxu0 %v4919_v24  ;;  %v5695_v2 = vand.u32 4294901760, %v5694_v57  ;;  %v5699_v24 = vand.u32 4294901760, %v5698_v31 }
 0x159   :  { %v1474_v38 = vsub.f32 %v5698_v31, %v5699_v24 }
 0x15a   :  { %3643 = vmatmul.mubr.f32.gmra.mrb[6].mxu0 %v4931_v59 }
 0x15b   :  { %3645 = vmatprep.mubr.f32.mxu0 %v4943_v43  ;;  %v1475_v21 = vand.u32 4294901760, %v1474_v38  ;;  %v5723_v38 = vld [vmem:[#allocation11_spill] sm:$0xff] }
 0x15e   :  { %3646 = vmatmul.mubr.f32.gmra.mrb[8].mxu0 %v4955_v26  ;;  %v5692_v26 = vld [vmem:[#allocation8_spill] sm:$0xff] }
 0x15f   :  { %3648 = vmatprep.mubr.f32.mxu0 %v4967_v11  ;;  %v1579_v11 = vsub.f32 %v4590_v49, %v4842_v15  ;;  %v1454_v49 = vsub.f32 %v5694_v57, %v5695_v2 }
 0x161   :  { %v1580_v59 = vand.u32 4294901760, %v1579_v11  ;;  %v1455_v15 = vand.u32 4294901760, %v1454_v49  ;;  %v5719_v49 = vld [vmem:[#allocation5_spill] sm:$0xff] }
 0x162   :  { %3649 = vmatmul.mubr.f32.gmra.mrb[10].mxu0 %v4979_v47  ;;  %v1415_v47 = vand.u32 4294901760, %v4644_v0 }
 0x163   :  { %3651 = vmatprep.mubr.f32.mxu0 %v4991_v58  ;;  %v5691_v58 = vand.u32 4294901760, %v4647_v1 }
 0x165   :  { %v1434_v52 = vsub.f32 %v4647_v1, %v5691_v58 }
 0x166   :  { %3652 = vmatmul.mubr.f32.gmra.mrb[12].mxu0 %v5003_v4  ;;  %v1425_v4 = vand.u32 4294901760, %v1424_v51  ;;  %v1545_v51 = vand.u32 4294901760, %v1544_v45 }
 0x167   :  { %3654 = vmatprep.mubr.f32.mxu0 %v5015_v20  ;;  %v5693_v20 = vand.u32 4294901760, %v5692_v26  ;;  %v1435_v62 = vand.u32 4294901760, %v1434_v52 }
 0x169   :  { %v1444_v43 = vsub.f32 %v5692_v26, %v5693_v20  ;;  %v5716_v26 = vld [vmem:[#allocation2_spill] sm:$0xff] }
 0x16a   :  { %3655 = vmatmul.mubr.f32.gmra.mrb[14].mxu0 %v5027_v33  ;;  %v5696_v33 = vld [vmem:[#allocation12_spill] sm:$0xff] }
 0x16b   :  { %3663 = vmatprep.mubr.f32.mxu0 %v1405_v37  ;;  %v1445_v0 = vand.u32 4294901760, %v1444_v43  ;;  %v5697_v55 = vand.u32 4294901760, %v5696_v33  ;;  %v5715_v37 = vand.u32 4294901760, %v5714_v30 }
 0x16d   :  { %v1464_v1 = vsub.f32 %v5696_v33, %v5697_v55  ;;  %v1554_v42 = vsub.f32 %v5714_v30, %v5715_v37 }
 0x16e   :  { %3664 = vmatmul.mubr.f32.vlgmr.msra.gmra.mrb[16].mxu0 %v1415_v47 }
 0x16f   :  { %4102 = vmatpush3.bf16.msra.mxu0 %v4099_v36  ;;  %3666 = vmatprep.mubr.f32.mxu0 %v1425_v4  ;;  %v1465_v23 = vand.u32 4294901760, %v1464_v1  ;;  %v1555_v58 = vand.u32 4294901760, %v1554_v42  ;;  %v5721_v1 = vld [vmem:[#allocation7_spill] sm:$0xff] }
 0x170   :  { %3691 = vmatprep.subr.mxu0 %v1580_v59 }
 0x172   :  { %3667 = vmatmul.mubr.f32.gmra.mrb[18].mxu0 %v1435_v62  ;;  %v5718_v62 = vld [vmem:[#allocation4_spill] sm:$0xff] }
 0x173   :  { %3669 = vmatprep.mubr.f32.mxu0 %v1445_v0  ;;  %3692 = vmatpush3.msra.mxu0 %v1580_v59  ;;  %v5717_v59 = vld [vmem:[#allocation3_spill] sm:$0xff]  ;;  %v5720_v0 = vld [vmem:[#allocation6_spill] sm:$0xff] }
 0x174   :  { %4119 = vmatprep.subr.bf16.mxu0 %v4440_v61 }
 0x176   :  { %3670 = vmatmul.mubr.f32.gmra.mrb[20].mxu0 %v1455_v15  ;;  %v5722_v15 = vld [vmem:[#allocation10_spill] sm:$0xff] }
 0x177   :  { %3672 = vmatprep.mubr.f32.mxu0 %v1465_v23  ;;  %v5724_v23 = vld [vmem:[#allocation14_spill] sm:$0xff] }
 0x17a   :  { %3673 = vmatmul.mubr.f32.gmra.mrb[22].mxu0 %v1475_v21  ;;  %v5725_v21 = vmov 0.0  }
 0x17b   :  { %3675 = vmatprep.mubr.f32.mxu0 %v1485_v22  ;;  %3904 = vmatprep.mubr.msk.f32.mxu1 %vm4441_vm12, %v5725_v21 }
 0x17d   :  { %v5238_v14 = vpop.f32.mrb[0].mxu1 }
 0x17e   :  { %3676 = vmatmul.mubr.f32.gmra.mrb[24].mxu0 %v1495_v40  ;;  %v5240_v36 = vpop.f32.mrb[1].mxu1 }
 0x17f   :  { %3678 = vmatprep.mubr.f32.mxu0 %v1505_v60 }
 0x181   :  { %v5245_v11 = vpop.f32.mrb[2].mxu1 }
 0x182   :  { %3679 = vmatmul.mubr.f32.gmra.mrb[26].mxu0 %v1515_v29  ;;  %v5247_v47 = vpop.f32.mrb[3].mxu1 }
 0x183   :  { %3681 = vmatprep.mubr.f32.mxu0 %v1525_v12 }
 0x185   :  { %v5249_v52 = vpop.f32.mrb[4].mxu1 }
 0x186   :  { %3682 = vmatmul.mubr.f32.gmra.mrb[28].mxu0 %v1535_v18  ;;  %v5251_v4 = vpop.f32.mrb[5].mxu1 }
 0x187   :  { %3684 = vmatprep.mubr.f32.mxu0 %v1545_v51 }
 0x189   :  { %v5254_v20 = vpop.f32.mrb[6].mxu1 }
 0x18a   :  { %3685 = vmatmul.mubr.f32.gmra.mrb[30].mxu0 %v1555_v58  ;;  %v5256_v43 = vpop.f32.mrb[7].mxu1 }
 0x18b   :  { %3693 = vmatprep.mubr.f32.mxu0 %v5716_v26 }
 0x18d   :  { %v5260_v57 = vpop.f32.mrb[8].mxu1 }
 0x18e   :  { %3694 = vmatmul.mubr.f32.vlgmr.msra.gmra.mrb[16].mxu0 %v5717_v59  ;;  %v5262_v2 = vpop.f32.mrb[9].mxu1 }
 0x18f   :  { %3696 = vmatprep.mubr.f32.mxu0 %v5718_v62 }
 0x191   :  { %v5266_v33 = vpop.f32.mrb[10].mxu1 }
 0x192   :  { %3697 = vmatmul.mubr.f32.gmra.mrb[18].mxu0 %v5719_v49  ;;  %v5268_v55 = vpop.f32.mrb[11].mxu1 }
 0x193   :  { %3699 = vmatprep.mubr.f32.mxu0 %v5720_v0 }
 0x195   :  { %v5272_v31 = vpop.f32.mrb[12].mxu1 }
 0x196   :  { %3700 = vmatmul.mubr.f32.gmra.mrb[20].mxu0 %v5721_v1  ;;  %v5274_v24 = vpop.f32.mrb[13].mxu1 }
 0x197   :  { %3702 = vmatprep.mubr.f32.mxu0 %v5722_v15 }
 0x199   :  { %v5278_v9 = vpop.f32.mrb[14].mxu1 }
 0x19a   :  { %3703 = vmatmul.mubr.f32.gmra.mrb[22].mxu0 %v5723_v38  ;;  %v5280_v50 = vpop.f32.mrb[15].mxu1 }
 0x19b   :  { %3705 = vmatprep.mubr.f32.mxu0 %v5724_v23 }
 0x19e   :  { %3706 = vmatmul.mubr.f32.gmra.mrb[24].mxu0 %v4698_v35 }
 0x19f   :  { %3708 = vmatprep.mubr.f32.mxu0 %v4718_v46 }
 0x1a2   :  { %3709 = vmatmul.mubr.f32.gmra.mrb[26].mxu0 %v4722_v53 }
 0x1a3   :  { %3711 = vmatprep.mubr.f32.mxu0 %v4738_v3 }
 0x1a6   :  { %3712 = vmatmul.mubr.f32.gmra.mrb[28].mxu0 %v4742_v10 }
 0x1a7   :  { %3714 = vmatprep.mubr.f32.mxu0 %v4758_v32 }
 0x1aa   :  { %3715 = vmatmul.mubr.f32.gmra.mrb[30].mxu0 %v4762_v39 }
 0x1ab   :  { %3869 = vmatprep.mubr.msk.f32.mxu0 %vm4441_vm12, %v5725_v21 }
 0x221   :  { %v3635_v35 = vpop.f32.mrb[0].mxu0 }
 0x222   :  { %v1190_v46 = vpop.f32.mrb[1].mxu0 }
 0x225   :  { %v3638_v53 = vpop.f32.mrb[2].mxu0 }
 0x226   :  { %v1202_v3 = vpop.f32.mrb[3].mxu0 }
 0x229   :  { %v3641_v10 = vpop.f32.mrb[4].mxu0 }
 0x22a   :  { %v1214_v32 = vpop.f32.mrb[5].mxu0 }
 0x22d   :  { %v3644_v44 = vpop.f32.mrb[6].mxu0 }
 0x22e   :  { %v5295_v39 = vpop.f32.mrb[7].mxu0 }
 0x231   :  { %v5297_v16 = vpop.f32.mrb[8].mxu0 }
 0x232   :  { %v5299_v17 = vpop.f32.mrb[9].mxu0 }
 0x235   :  { %v5301_v22 = vpop.f32.mrb[10].mxu0 }
 0x236   :  { %v5303_v19 = vpop.f32.mrb[11].mxu0 }
 0x239   :  { %v5305_v6 = vpop.f32.mrb[12].mxu0 }
 0x23a   :  { %v5307_v54 = vpop.f32.mrb[13].mxu0 }
 0x23d   :  { %v5309_v40 = vpop.f32.mrb[14].mxu0 }
 0x23e   :  { %v5311_v27 = vpop.f32.mrb[15].mxu0 }
 0x261   :  { %v3695_v28 = vpop.f32.mrb[16].mxu0 }
 0x262   :  { %v4263_v5 = vadd.f32 %v5238_v14, %v3695_v28  ;;  %v1643_v60 = vpop.f32.mrb[17].mxu0 }
 0x263   :  { %v4264_v48 = vadd.f32 %v5240_v36, %v1643_v60 }
 0x264   :  { %v2451_v63 = vmul.f32 %v4263_v5, %v3635_v35 }
 0x265   :  { %v2450_v25 = vmul.f32 %v4264_v48, %v1190_v46  ;;  %v3698_v29 = vpop.f32.mrb[18].mxu0 }
 0x266   :  { %v2470_v8 = vand.u32 4294901760, %v2451_v63  ;;  %v4265_v13 = vadd.f32 %v5245_v11, %v3698_v29  ;;  %v1655_v7 = vpop.f32.mrb[19].mxu0 }
 0x267   :  { %v2467_v12 = vand.u32 4294901760, %v2450_v25  ;;  %v4266_v34 = vadd.f32 %v5247_v47, %v1655_v7 }
 0x268   :  { %v5317_v41 = vsub.f32 %v2451_v63, %v2470_v8  ;;  %v2453_v45 = vmul.f32 %v4265_v13, %v3638_v53 }
 0x269   :  { %v5319_v18 = vpack.c.bf16 %v2470_v8, %v2467_v12  ;;  %v5321_v30 = vsub.f32 %v2450_v25, %v2467_v12  ;;  %v2452_v14 = vmul.f32 %v4266_v34, %v1202_v3  ;;  %v3701_v37 = vpop.f32.mrb[20].mxu0 }
 0x26a   :  { %v2562_v36 = vand.u32 4294901760, %v5317_v41  ;;  %v2476_v42 = vand.u32 4294901760, %v2453_v45  ;;  %v4267_v51 = vadd.f32 %v5249_v52, %v3701_v37  ;;  %v1667_v58 = vpop.f32.mrb[21].mxu0 }
 0x26b   :  { %v2555_v11 = vand.u32 4294901760, %v5321_v30  ;;  %v2473_v26 = vand.u32 4294901760, %v2452_v14  ;;  %v4268_v47 = vadd.f32 %v5251_v4, %v1667_v58  ;;  %4121 = vmatpush3.bf16.msra.mxu0 %v5319_v18  ;;  %v4168_v59 = vpack.c.bf16 %v5317_v41, %v5321_v30 }
 0x26c   :  { %v2563_v62 = vsub.f32 %v5317_v41, %v2562_v36  ;;  %v5333_v49 = vsub.f32 %v2453_v45, %v2476_v42  ;;  %v2455_v0 = vmul.f32 %v4267_v51, %v3641_v10  ;;  %4122 = vmatprep.subr.bf16.mxu0 %v4440_v61 }
 0x26d   :  { %v2556_v52 = vsub.f32 %v5321_v30, %v2555_v11  ;;  %v5339_v1 = vpack.c.bf16 %v2476_v42, %v2473_v26  ;;  %v5341_v4 = vsub.f32 %v2452_v14, %v2473_v26  ;;  %v2454_v15 = vmul.f32 %v4268_v47, %v1214_v32  ;;  %v3704_v38 = vpop.f32.mrb[22].mxu0 }
 0x26e   :  { %v2576_v23 = vand.u32 4294901760, %v5333_v49  ;;  %v2482_v35 = vand.u32 4294901760, %v2455_v0  ;;  %v4269_v46 = vadd.f32 %v5254_v20, %v3704_v38  ;;  %v1679_v53 = vpop.f32.mrb[23].mxu0  ;;  %v2564_v3 = vand.u32 4294901760, %v2563_v62 }
 0x26f   :  { %v2569_v10 = vand.u32 4294901760, %v5341_v4  ;;  %v2479_v28 = vand.u32 4294901760, %v2454_v15  ;;  %v4270_v5 = vadd.f32 %v5256_v43, %v1679_v53  ;;  %4124 = vmatpush3.bf16.msra.mxu0 %v5339_v1  ;;  %v2557_v60 = vand.u32 4294901760, %v2556_v52 }
 0x270   :  { %v2577_v32 = vsub.f32 %v5333_v49, %v2576_v23  ;;  %v5351_v48 = vsub.f32 %v2455_v0, %v2482_v35  ;;  %v2457_v63 = vmul.f32 %v4269_v46, %v3644_v44  ;;  %4125 = vmatprep.subr.bf16.mxu0 %v4440_v61  ;;  %v4171_v20 = vpack.c.bf16 %v5333_v49, %v5341_v4 }
 0x271   :  { %v2570_v25 = vsub.f32 %v5341_v4, %v2569_v10  ;;  %v5359_v43 = vpack.c.bf16 %v2482_v35, %v2479_v28  ;;  %v5361_v29 = vsub.f32 %v2454_v15, %v2479_v28  ;;  %v2456_v8 = vmul.f32 %v4270_v5, %v5295_v39  ;;  %v3707_v13 = vpop.f32.mrb[24].mxu0 }
 0x272   :  { %v2590_v7 = vand.u32 4294901760, %v5351_v48  ;;  %v2488_v12 = vand.u32 4294901760, %v2457_v63  ;;  %v4271_v44 = vadd.f32 %v5260_v57, %v3707_v13  ;;  %v1691_v34 = vpop.f32.mrb[25].mxu0  ;;  %v4144_v45 = vpack.c.bf16 %v2564_v3, %v2557_v60 }
 0x273   :  { %v2583_v14 = vand.u32 4294901760, %v5361_v29  ;;  %v2485_v37 = vand.u32 4294901760, %v2456_v8  ;;  %v4272_v42 = vadd.f32 %v5262_v2, %v1691_v34  ;;  %4127 = vmatpush3.bf16.msra.mxu0 %v5359_v43  ;;  %v2571_v51 = vand.u32 4294901760, %v2570_v25 }
 0x274   :  { %v2591_v39 = vsub.f32 %v5351_v48, %v2590_v7  ;;  %v5372_v58 = vsub.f32 %v2457_v63, %v2488_v12  ;;  %v2459_v26 = vmul.f32 %v4271_v44, %v5297_v16  ;;  %4145 = vmatpush3.bf16.msra.mxu1 %v4144_v45  ;;  %4128 = vmatprep.subr.bf16.mxu0 %v4440_v61  ;;  %v2578_v57 = vand.u32 4294901760, %v2577_v32 }
 0x275   :  { %v2584_v47 = vsub.f32 %v5361_v29, %v2583_v14  ;;  %v5379_v2 = vpack.c.bf16 %v2488_v12, %v2485_v37  ;;  %v5381_v62 = vsub.f32 %v2456_v8, %v2485_v37  ;;  %v2458_v0 = vmul.f32 %v4272_v42, %v5299_v17  ;;  %v3710_v52 = vpop.f32.mrb[26].mxu0  ;;  %4146 = vmatprep.subr.bf16.mxu1 %v4440_v61 }
 0x276   :  { %v2604_v15 = vand.u32 4294901760, %v5372_v58  ;;  %v2494_v16 = vand.u32 4294901760, %v2459_v26  ;;  %v4273_v38 = vadd.f32 %v5266_v33, %v3710_v52  ;;  %v1703_v35 = vpop.f32.mrb[27].mxu0  ;;  %v4147_v46 = vpack.c.bf16 %v2578_v57, %v2571_v51 }
 0x277   :  { %v2597_v53 = vand.u32 4294901760, %v5381_v62  ;;  %v2491_v3 = vand.u32 4294901760, %v2458_v0  ;;  %v4274_v28 = vadd.f32 %v5268_v55, %v1703_v35  ;;  %4130 = vmatpush3.bf16.msra.mxu0 %v5379_v2  ;;  %v2585_v5 = vand.u32 4294901760, %v2584_v47 }
 0x278   :  { %v2605_v17 = vsub.f32 %v5372_v58, %v2604_v15  ;;  %v5393_v60 = vsub.f32 %v2459_v26, %v2494_v16  ;;  %v2461_v32 = vmul.f32 %v4273_v38, %v5301_v22  ;;  %4148 = vmatpush3.bf16.msra.mxu1 %v4147_v46  ;;  %4131 = vmatprep.subr.bf16.mxu0 %v4440_v61  ;;  %v2592_v33 = vand.u32 4294901760, %v2591_v39 }
 0x279   :  { %v2598_v63 = vsub.f32 %v5381_v62, %v2597_v53  ;;  %v5400_v55 = vpack.c.bf16 %v2494_v16, %v2491_v3  ;;  %v5402_v25 = vsub.f32 %v2458_v0, %v2491_v3  ;;  %v2460_v8 = vmul.f32 %v4274_v28, %v5303_v19  ;;  %v3713_v13 = vpop.f32.mrb[28].mxu0  ;;  %4149 = vmatprep.subr.bf16.mxu1 %v4440_v61 }
 0x27a   :  { %v2618_v12 = vand.u32 4294901760, %v5393_v60  ;;  %v2500_v22 = vand.u32 4294901760, %v2461_v32  ;;  %v4275_v44 = vadd.f32 %v5272_v31, %v3713_v13  ;;  %v1715_v34 = vpop.f32.mrb[29].mxu0  ;;  %v4150_v45 = vpack.c.bf16 %v2592_v33, %v2585_v5 }
 0x27b   :  { %v2611_v37 = vand.u32 4294901760, %v5402_v25  ;;  %v2497_v42 = vand.u32 4294901760, %v2460_v8  ;;  %v4276_v51 = vadd.f32 %v5274_v24, %v1715_v34  ;;  %4133 = vmatpush3.bf16.msra.mxu0 %v5400_v55  ;;  %v2599_v39 = vand.u32 4294901760, %v2598_v63 }
 0x27c   :  { %v2619_v19 = vsub.f32 %v5393_v60, %v2618_v12  ;;  %v5414_v26 = vsub.f32 %v2461_v32, %v2500_v22  ;;  %v2463_v57 = vmul.f32 %v4275_v44, %v5305_v6  ;;  %4151 = vmatpush3.bf16.msra.mxu1 %v4150_v45  ;;  %4134 = vmatprep.subr.bf16.mxu0 %v4440_v61  ;;  %v2606_v31 = vand.u32 4294901760, %v2605_v17 }
 0x27d   :  { %v2612_v47 = vsub.f32 %v5402_v25, %v2611_v37  ;;  %v5421_v24 = vpack.c.bf16 %v2500_v22, %v2497_v42  ;;  %v5423_v0 = vsub.f32 %v2460_v8, %v2497_v42  ;;  %v2462_v52 = vmul.f32 %v4276_v51, %v5307_v54  ;;  %v3716_v16 = vpop.f32.mrb[30].mxu0  ;;  %4152 = vmatprep.subr.bf16.mxu1 %v4440_v61 }
 0x27e   :  { %v2632_v38 = vand.u32 4294901760, %v5414_v26  ;;  %v2506_v6 = vand.u32 4294901760, %v2463_v57  ;;  %v4277_v35 = vadd.f32 %v5278_v9, %v3716_v16  ;;  %v1727_v46 = vpop.f32.mrb[31].mxu0  ;;  %v4153_v3 = vpack.c.bf16 %v2606_v31, %v2599_v39 }
 0x27f   :  { %v2625_v28 = vand.u32 4294901760, %v5423_v0  ;;  %v2503_v5 = vand.u32 4294901760, %v2462_v52  ;;  %v4278_v17 = vadd.f32 %v5280_v50, %v1727_v46  ;;  %4136 = vmatpush3.bf16.msra.mxu0 %v5421_v24  ;;  %v2613_v32 = vand.u32 4294901760, %v2612_v47 }
 0x280   :  { %v2633_v54 = vsub.f32 %v5414_v26, %v2632_v38  ;;  %v5433_v33 = vsub.f32 %v2463_v57, %v2506_v6  ;;  %v2465_v63 = vmul.f32 %v4277_v35, %v5309_v40  ;;  %4154 = vmatpush3.bf16.msra.mxu1 %v4153_v3  ;;  %4137 = vmatprep.subr.bf16.mxu0 %v4440_v61  ;;  %v2620_v9 = vand.u32 4294901760, %v2619_v19 }
 0x281   :  { %v2626_v8 = vsub.f32 %v5423_v0, %v2625_v28  ;;  %v5438_v13 = vpack.c.bf16 %v2506_v6, %v2503_v5  ;;  %v5440_v22 = vsub.f32 %v2462_v52, %v2503_v5  ;;  %v2464_v50 = vmul.f32 %v4278_v17, %v5311_v27  ;;  %4155 = vmatprep.subr.bf16.mxu1 %v4440_v61 }
 0x282   :  { %v2646_v44 = vand.u32 4294901760, %v5433_v33  ;;  %v2512_v34 = vand.u32 4294901760, %v2465_v63  ;;  %v4156_v45 = vpack.c.bf16 %v2620_v9, %v2613_v32  ;;  %v2634_v42 = vand.u32 4294901760, %v2633_v54 }
 0x283   :  { %v2639_v40 = vand.u32 4294901760, %v5440_v22  ;;  %v2509_v51 = vand.u32 4294901760, %v2464_v50  ;;  %4139 = vmatpush3.bf16.msra.mxu0 %v5438_v13  ;;  %v2627_v39 = vand.u32 4294901760, %v2626_v8  ;;  %v4174_v19 = vpack.c.bf16 %v5351_v48, %v5361_v29 }
 0x284   :  { %v2647_v57 = vsub.f32 %v5433_v33, %v2646_v44  ;;  %v2659_v31 = vsub.f32 %v2465_v63, %v2512_v34  ;;  %4157 = vmatpush3.bf16.msra.mxu1 %v4156_v45  ;;  %4140 = vmatprep.subr.bf16.mxu0 %v4440_v61  ;;  %v4177_v27 = vpack.c.bf16 %v5372_v58, %v5381_v62 }
 0x285   :  { %v2640_v47 = vsub.f32 %v5440_v22, %v2639_v40  ;;  %v5454_v52 = vpack.c.bf16 %v2512_v34, %v2509_v51  ;;  %v2652_v16 = vsub.f32 %v2464_v50, %v2509_v51  ;;  %4158 = vmatprep.subr.bf16.mxu1 %v4440_v61  ;;  %v4159_v6 = vpack.c.bf16 %v2634_v42, %v2627_v39 }
 0x286   :  { %v2660_v35 = vand.u32 4294901760, %v2659_v31  ;;  %v2648_v46 = vand.u32 4294901760, %v2647_v57  ;;  %v4180_v3 = vpack.c.bf16 %v5393_v60, %v5402_v25  ;;  %v4183_v5 = vpack.c.bf16 %v5414_v26, %v5423_v0 }
 0x287   :  { %v2653_v17 = vand.u32 4294901760, %v2652_v16  ;;  %4142 = vmatpush3.bf16.msra.mxu0 %v5454_v52  ;;  %v2641_v32 = vand.u32 4294901760, %v2640_v47  ;;  %v4186_v54 = vpack.c.bf16 %v5433_v33, %v5440_v22  ;;  %v4189_v63 = vpack.c.bf16 %v2659_v31, %v2652_v16 }
 0x288   :  { %v2661_v9 = vsub.f32 %v2659_v31, %v2660_v35  ;;  %4160 = vmatpush3.bf16.msra.mxu1 %v4159_v6  ;;  %v4216_v8 = vpack.c.bf16 %v2562_v36, %v2555_v11  ;;  %v4219_v26 = vpack.c.bf16 %v2576_v23, %v2569_v10  ;;  %v4222_v0 = vpack.c.bf16 %v2590_v7, %v2583_v14 }
 0x289   :  { %v2654_v50 = vsub.f32 %v2652_v16, %v2653_v17  ;;  %4161 = vmatprep.subr.bf16.mxu1 %v4440_v61  ;;  %v4162_v33 = vpack.c.bf16 %v2648_v46, %v2641_v32  ;;  %v4225_v22 = vpack.c.bf16 %v2604_v15, %v2597_v53  ;;  %v4228_v36 = vpack.c.bf16 %v2618_v12, %v2611_v37 }
 0x28a   :  { %v2662_v11 = vand.u32 4294901760, %v2661_v9  ;;  %v4231_v23 = vpack.c.bf16 %v2632_v38, %v2625_v28  ;;  %v4234_v10 = vpack.c.bf16 %v2646_v44, %v2639_v40  ;;  %v4237_v29 = vpack.c.bf16 %v2660_v35, %v2653_v17  ;;  %3870 = vmatmul.mubr.f32.vlgmr.msra.gmra.mrb[32].mxu0 %v5725_v21 }
 0x28b   :  { %v2655_v48 = vand.u32 4294901760, %v2654_v50 }
 0x28c   :  { %4163 = vmatpush3.bf16.msra.mxu1 %v4162_v33 }
 0x28d   :  { %4164 = vmatprep.subr.bf16.mxu1 %v4440_v61  ;;  %v4165_v7 = vpack.c.bf16 %v2662_v11, %v2655_v48 }
 0x290   :  { %4166 = vmatpush3.bf16.msra.mxu1 %v4165_v7 }
 0x291   :  { %4167 = vmatprep.subr.bf16.mxu1 %v4440_v61 }
 0x293   :  { %3905 = vmatmul.mubr.f32.vlgmr.msra.gmra.mrb[16].mxu1 %v5688_v56 }
 0x294   :  { %4169 = vmatpush3.bf16.msra.mxu1 %v4168_v59  ;;  %3939 = vmatprep.mubr.msk.f32.mxu1 %vm4441_vm12, %v5725_v21 }
 0x295   :  { %4170 = vmatprep.subr.bf16.mxu1 %v4440_v61 }
 0x298   :  { %4172 = vmatpush3.bf16.msra.mxu1 %v4171_v20 }
 0x299   :  { %4173 = vmatprep.subr.bf16.mxu1 %v4440_v61 }
 0x29c   :  { %4175 = vmatpush3.bf16.msra.mxu1 %v4174_v19 }
 0x29d   :  { %4176 = vmatprep.subr.bf16.mxu1 %v4440_v61 }
 0x2a0   :  { %4178 = vmatpush3.bf16.msra.mxu1 %v4177_v27 }
 0x2a1   :  { %4179 = vmatprep.subr.bf16.mxu1 %v4440_v61 }
 0x2a4   :  { %4181 = vmatpush3.bf16.msra.mxu1 %v4180_v3 }
 0x2a5   :  { %4182 = vmatprep.subr.bf16.mxu1 %v4440_v61 }
 0x2a8   :  { %4184 = vmatpush3.bf16.msra.mxu1 %v4183_v5 }
 0x2a9   :  { %4185 = vmatprep.subr.bf16.mxu1 %v4440_v61 }
 0x2ac   :  { %4187 = vmatpush3.bf16.msra.mxu1 %v4186_v54 }
 0x2ad   :  { %4188 = vmatprep.subr.bf16.mxu1 %v4440_v61 }
 0x2b0   :  { %4190 = vmatpush3.bf16.msra.mxu1 %v4189_v63 }
 0x2b1   :  { %4191 = vmatprep.subr.bf16.mxu1 %v4440_v61 }
 0x2b3   :  { %3940 = vmatmul.mubr.f32.vlgmr.msra.gmra.mrb[16].mxu1 %v5725_v21 }
 0x2b4   :  { %4193 = vmatpush3.bf16.msra.mxu1 %v5319_v18  ;;  %3974 = vmatprep.mubr.msk.f32.mxu1 %vm4441_vm12, %v5725_v21 }
 0x2b5   :  { %4194 = vmatprep.subr.bf16.mxu1 %v4440_v61 }
 0x2b8   :  { %4196 = vmatpush3.bf16.msra.mxu1 %v5339_v1 }
 0x2b9   :  { %4197 = vmatprep.subr.bf16.mxu1 %v4440_v61 }
 0x2bc   :  { %4199 = vmatpush3.bf16.msra.mxu1 %v5359_v43 }
 0x2bd   :  { %4200 = vmatprep.subr.bf16.mxu1 %v4440_v61 }
 0x2c0   :  { %4202 = vmatpush3.bf16.msra.mxu1 %v5379_v2 }
 0x2c1   :  { %4203 = vmatprep.subr.bf16.mxu1 %v4440_v61 }
 0x2c4   :  { %4205 = vmatpush3.bf16.msra.mxu1 %v5400_v55 }
 0x2c5   :  { %4206 = vmatprep.subr.bf16.mxu1 %v4440_v61 }
 0x2c8   :  { %4208 = vmatpush3.bf16.msra.mxu1 %v5421_v24 }
 0x2c9   :  { %4209 = vmatprep.subr.bf16.mxu1 %v4440_v61 }
 0x2cc   :  { %4211 = vmatpush3.bf16.msra.mxu1 %v5438_v13 }
 0x2cd   :  { %4212 = vmatprep.subr.bf16.mxu1 %v4440_v61 }
 0x2d0   :  { %4214 = vmatpush3.bf16.msra.mxu1 %v5454_v52 }
 0x2d1   :  { %4215 = vmatprep.subr.bf16.mxu1 %v4440_v61 }
 0x2d3   :  { %3975 = vmatmul.mubr.f32.vlgmr.msra.gmra.mrb[16].mxu1 %v5725_v21 }
 0x2d4   :  { %4217 = vmatpush3.bf16.msra.mxu1 %v4216_v8  ;;  %4009 = vmatprep.mubr.msk.f32.mxu1 %vm4441_vm12, %v5725_v21 }
 0x2d5   :  { %4218 = vmatprep.subr.bf16.mxu1 %v4440_v61 }
 0x2d8   :  { %4220 = vmatpush3.bf16.msra.mxu1 %v4219_v26 }
 0x2d9   :  { %4221 = vmatprep.subr.bf16.mxu1 %v4440_v61 }
 0x2dc   :  { %4223 = vmatpush3.bf16.msra.mxu1 %v4222_v0 }
 0x2dd   :  { %4224 = vmatprep.subr.bf16.mxu1 %v4440_v61 }
 0x2e0   :  { %4226 = vmatpush3.bf16.msra.mxu1 %v4225_v22 }
 0x2e1   :  { %4227 = vmatprep.subr.bf16.mxu1 %v4440_v61 }
 0x2e4   :  { %4229 = vmatpush3.bf16.msra.mxu1 %v4228_v36 }
 0x2e5   :  { %4230 = vmatprep.subr.bf16.mxu1 %v4440_v61 }
 0x2e8   :  { %4232 = vmatpush3.bf16.msra.mxu1 %v4231_v23 }
 0x2e9   :  { %4233 = vmatprep.subr.bf16.mxu1 %v4440_v61 }
 0x2ec   :  { %4235 = vmatpush3.bf16.msra.mxu1 %v4234_v10 }
 0x2ed   :  { %4236 = vmatprep.subr.bf16.mxu1 %v4440_v61 }
 0x2f0   :  { %4238 = vmatpush3.bf16.msra.mxu1 %v4237_v29 }
 0x2f1   :  { %4239 = vmatprep.subr.bf16.mxu1 %v4440_v61 }
 0x2f3   :  { %4010 = vmatmul.mubr.f32.vlgmr.msra.gmra.mrb[16].mxu1 %v5688_v56 }
 0x2f4   :  { %4241 = vmatpush3.bf16.msra.mxu1 %v5319_v18  ;;  %4044 = vmatprep.mubr.msk.f32.mxu1 %vm4441_vm12, %v5725_v21 }
 0x2f5   :  { %4242 = vmatprep.subr.bf16.mxu1 %v4440_v61 }
 0x2f8   :  { %4244 = vmatpush3.bf16.msra.mxu1 %v5339_v1 }
 0x2f9   :  { %4245 = vmatprep.subr.bf16.mxu1 %v4440_v61 }
 0x2fc   :  { %4247 = vmatpush3.bf16.msra.mxu1 %v5359_v43 }
 0x2fd   :  { %4248 = vmatprep.subr.bf16.mxu1 %v4440_v61 }
 0x300   :  { %4250 = vmatpush3.bf16.msra.mxu1 %v5379_v2 }
 0x301   :  { %4251 = vmatprep.subr.bf16.mxu1 %v4440_v61 }
 0x304   :  { %4253 = vmatpush3.bf16.msra.mxu1 %v5400_v55 }
 0x305   :  { %4254 = vmatprep.subr.bf16.mxu1 %v4440_v61 }
 0x308   :  { %4256 = vmatpush3.bf16.msra.mxu1 %v5421_v24 }
 0x309   :  { %4257 = vmatprep.subr.bf16.mxu1 %v4440_v61 }
 0x30c   :  { %4259 = vmatpush3.bf16.msra.mxu1 %v5438_v13 }
 0x30d   :  { %4260 = vmatprep.subr.bf16.mxu1 %v4440_v61 }
 0x310   :  { %4262 = vmatpush3.bf16.msra.mxu1 %v5454_v52 }
 0x313   :  { %4045 = vmatmul.mubr.f32.vlgmr.msra.gmra.mrb[16].mxu1 %v5688_v56 }
 0x35d   :  { %v2548_v21 = vpop.f32.mrb[32].mxu0 }
 0x35e   :  { %v3871_v41 = vpop.f32.mrb[33].mxu0 }
 0x3e6   :  { %v3090_v18 = vpop.f32.mrb[16].mxu1 }
 0x3e7   :  { %v4279_v30 = vadd.f32 %v3090_v18, %v2548_v21  ;;  %v4046_v59 = vpop.f32.mrb[17].mxu1 }
 0x3e9   :  { %3094 = vst [vmem:[%s5561_s4] sm:$0x1] %v4279_v30 }

</bundles_post_ra>
